<compile_context>
chip_gen: v5e
topology: v5e:2x2
jax: 0.10.0
libtpu: 0.0.40
codegen_flags: <defaults>
</compile_context>

<pallas_src>
import functools

import jax
import jax.numpy as jnp
from jax import lax
from jax.experimental import pallas as pl
from jax.experimental.pallas import tpu as pltpu


def _upsample_matmul_kernel(x_ref, m_ref, o_ref, *, precision):
    # x_ref: (TBR, K)   m_ref: (K, K*s*s)   o_ref: (TBR, K*s*s)
    o_ref[...] = jnp.dot(
        x_ref[...],
        m_ref[...],
        precision=precision,
        preferred_element_type=jnp.float32,
    ).astype(o_ref.dtype)


def _expansion_matrix(W, s, F, dtype):
    """0/1 matrix E of shape (F*W, F*s*W*s).

    For a flattened group of F consecutive input rows x (length F*W),
    x @ E is the same data nearest-neighbour upsampled by s in H and W,
    flattened in the memory order of the (F*s, W*s) output rows:
    column c = f*(s*W*s) + i*(W*s) + w*s + j maps to row f*W + w.
    """
    rows = jnp.arange(F * W)
    cols = jnp.arange(F * s * W * s)
    r_f, r_w = rows // W, rows % W              # source fold-row / source col
    c_f = cols // (s * W * s)                   # dest fold-row
    c_w = (cols % (W * s)) // s                 # dest source-col
    eq = (c_f[None, :] == r_f[:, None]) & (c_w[None, :] == r_w[:, None])
    return eq.astype(dtype)


def _divisors(n):
    out = set()
    i = 1
    while i * i <= n:
        if n % i == 0:
            out.add(i)
            out.add(n // i)
        i += 1
    return sorted(out)


def _pick_fold(total_rows, W, s, dtype):
    """Fold F (any divisor of N*C*H) of consecutive flattened input rows.

    Preference order:
      3: out_cols multiple of 128 in [128, 512] and K <= k_cap  (lane-dense,
         HBM-bound on all generations)
      2: out_cols in [128, 512] and K <= k_cap
      1: K <= k_cap and out_cols <= 1024
      0: anything else (prefer out_cols closest to 256)
    Within a class, prefer the widest lane slab.
    """
    k_cap = 96 if jnp.dtype(dtype).itemsize == 4 else 256
    best_key, best_f = None, 1
    for f in _divisors(total_rows):
        k = f * W
        oc = k * s * s
        cls = 0
        if k <= k_cap and oc <= 1024:
            cls = 1
            if 128 <= oc <= 512:
                cls = 2
                if oc % 128 == 0:
                    cls = 3
        key = (cls, oc if cls >= 2 else -abs(oc - 256))
        if best_key is None or key > best_key:
            best_key, best_f = key, f
    return best_f


def _vmem_budget():
    """(per-step working-set budget, scoped vmem limit), generation-aware."""
    try:
        cap = int(pltpu.get_tpu_info().vmem_capacity_bytes)
    except Exception:
        cap = 0
    if cap >= 100 * 1024 * 1024:          # v5e / v6e: 128 MiB physical VMEM
        return 32 * 1024 * 1024, 80 * 1024 * 1024
    # v7x (64 MiB physical, 2 TCs share the chip) or unknown: stay conservative
    return 16 * 1024 * 1024, 48 * 1024 * 1024


def upsample_nearest(x, scale_factor):
    """Pallas TPU implementation of F.interpolate(x, scale_factor) (nearest).

    x: (N, C, H, W). scale_factor: positive int. Returns (N, C, H*s, W*s).
    """
    s = int(scale_factor)
    N, C, H, W = x.shape
    if s == 1:
        return x

    dtype = x.dtype
    if dtype not in (jnp.float32, jnp.bfloat16, jnp.float16):
        # TODO(synk): non-float dtypes skip the MXU path (v7x MXU has no int
        # support); plain-XLA fallback keeps semantics.
        return jnp.repeat(jnp.repeat(x, s, axis=2), s, axis=3)
    itemsize = jnp.dtype(dtype).itemsize

    total_rows = N * C * H
    F = _pick_fold(total_rows, W, s, dtype)
    in_cols = F * W                       # contraction dim K
    out_cols = in_cols * s * s            # lane dim of the stored slab

    if in_cols * out_cols * itemsize > (4 << 20):
        # TODO(synk): very wide W would need a column-tiled expansion matrix.
        return jnp.repeat(jnp.repeat(x, s, axis=2), s, axis=3)

    R = total_rows // F                   # rows of the 2-D problem

    # Dtype-aware precision: f32 needs HIGHEST for bit-exact replication;
    # bf16/f16 are exact with a single MXU pass (1.0*x + 0).
    if dtype == jnp.float32:
        precision = lax.Precision.HIGHEST
    else:
        precision = lax.Precision.DEFAULT

    # --- rows per block: fill a generation-aware double-buffered VMEM budget,
    # rounded to the dtype's native sublane multiple, with >=2 grid steps
    # whenever R allows (pipelining + v7x megacore sharding).
    sub = max(8, 32 // itemsize)          # 8 f32, 16 bf16/f16, 32 int8
    budget, vmem_limit = _vmem_budget()
    per_row = (2 * in_cols + 2 * out_cols) * itemsize + 4 * out_cols
    tbr = max(sub, budget // per_row)
    tbr = min(tbr, 8192)
    if R > sub:
        tbr = min(tbr, (R + 1) // 2)      # guarantee >= 2 grid steps
    tbr = min(tbr, R)
    if tbr < R:
        tbr = max(sub, (tbr // sub) * sub)

    x2 = x.reshape(R, in_cols)                        # free (contiguous) reshape
    E = _expansion_matrix(W, s, F, dtype)

    kernel = functools.partial(_upsample_matmul_kernel, precision=precision)
    out2 = pl.pallas_call(
        kernel,
        out_shape=jax.ShapeDtypeStruct((R, out_cols), dtype),
        grid=(pl.cdiv(R, tbr),),
        in_specs=[
            pl.BlockSpec((tbr, in_cols), lambda i: (i, 0)),
            pl.BlockSpec((in_cols, out_cols), lambda i: (0, 0)),  # resident E
        ],
        out_specs=pl.BlockSpec((tbr, out_cols), lambda i: (i, 0)),
        compiler_params=pltpu.CompilerParams(
            dimension_semantics=("parallel",),
            vmem_limit_bytes=vmem_limit,
        ),
    )(x2, E)

    return out2.reshape(N, C, H * s, W * s)           # free (contiguous) reshape


def _check(x, s):
    out = jax.block_until_ready(upsample_nearest(x, s))
    ref = jnp.repeat(jnp.repeat(x, s, axis=2), s, axis=3)
    assert out.shape == ref.shape, (out.shape, ref.shape)
    assert out.dtype == x.dtype
    err = float(jnp.max(jnp.abs(out.astype(jnp.float32) - ref.astype(jnp.float32))))
    assert jnp.allclose(out, ref, rtol=1e-5, atol=1e-6), f"max abs err {err}"


if __name__ == "__main__":
    key = jax.random.PRNGKey(0)
    k0, k1, k2, k3 = jax.random.split(key, 4)

    # Primary shape (matches the module's Upsample usage scale).
    N, C, H, W = 2, 4, 16, 16
    scale_factor = 2
    x = jax.random.normal(k0, (N, C, H, W), dtype=jnp.float32)
    _check(x, scale_factor)

    # Multi-grid-step path (several parallel blocks).
    x_big = jax.random.normal(k1, (2, 64, 8, 8), dtype=jnp.float32)
    _check(x_big, 2)

    # Partial final block + generalized fold path (lane-dense out_cols=128
    # even though W*s*s = 64): R not a multiple of the row-block size.
    x_odd = jax.random.normal(k2, (1, 130, 4, 4), dtype=jnp.float32)
    _check(x_odd, 2)

    # bf16 path: E in bf16, single-pass DEFAULT precision (still exact).
    x_bf16 = jax.random.normal(k3, (2, 4, 16, 16), dtype=jnp.bfloat16)
    _check(x_bf16, 2)

    print("KERNEL_OK")
</pallas_src>

<mosaic_0001>
module attributes {stable_mosaic.version = 11 : i64} {
  func.func @_upsample_matmul_kernel(%arg0: i32, %arg1: memref<16x64xf32, #tpu.memory_space<vmem>>, %arg2: memref<64x256xf32, #tpu.memory_space<vmem>>, %arg3: memref<16x256xf32, #tpu.memory_space<vmem>>) attributes {dimension_semantics = [#tpu.dimension_semantics<parallel>], iteration_bounds = array<i64: 2>, scalar_prefetch = 0 : i64, scratch_operands = 0 : i64, tpu.core_type = #tpu.core_type<tc>, window_params = [{transform_indices = @transform_0, window_bounds = array<i64: 16, 64>}, {pipeline_mode = #tpu.pipeline_mode<synchronous>, transform_indices = @transform_1, window_bounds = array<i64: 64, 256>}, {transform_indices = @transform_2, window_bounds = array<i64: 16, 256>}]} {
    %c0 = arith.constant 0 : index
    %c0_0 = arith.constant 0 : index
    %0 = vector.load %arg1[%c0, %c0_0] : memref<16x64xf32, #tpu.memory_space<vmem>>, vector<16x64xf32>
    %c0_1 = arith.constant 0 : index
    %c0_2 = arith.constant 0 : index
    %1 = vector.load %arg2[%c0_1, %c0_2] : memref<64x256xf32, #tpu.memory_space<vmem>>, vector<64x256xf32>
    %cst = arith.constant dense<0.000000e+00> : vector<16x256xf32>
    %2 = tpu.matmul %0, %1, %cst {dimension_numbers = #tpu.dot_dimension_numbers<[1], [0], [0], [1], [0, 0, 1, 1], [], []>, precision = #tpu.contract_precision<fp32>} : vector<16x64xf32>, vector<64x256xf32>, vector<16x256xf32> -> vector<16x256xf32>
    %c0_3 = arith.constant 0 : index
    %c0_4 = arith.constant 0 : index
    %3 = vector.load %arg3[%c0_3, %c0_4] : memref<16x256xf32, #tpu.memory_space<vmem>>, vector<16x256xf32>
    tpu.vector_store %arg3[%c0_3, %c0_4], %2 {strides = array<i32>} : memref<16x256xf32, #tpu.memory_space<vmem>>, vector<16x256xf32>,
    return
  }
  func.func @transform_0(%arg0: i32) -> (i32, i32) {
    %c0_i32 = arith.constant 0 : i32
    %c0_i32_0 = arith.constant 0 : i32
    return %arg0, %c0_i32 : i32, i32
  }
  func.func @transform_1(%arg0: i32) -> (i32, i32) {
    %c0_i32 = arith.constant 0 : i32
    %c0_i32_0 = arith.constant 0 : i32
    %c0_i32_1 = arith.constant 0 : i32
    return %c0_i32, %c0_i32_0 : i32, i32
  }
  func.func @transform_2(%arg0: i32) -> (i32, i32) {
    %c0_i32 = arith.constant 0 : i32
    %c0_i32_0 = arith.constant 0 : i32
    return %arg0, %c0_i32 : i32, i32
  }
}

</mosaic_0001>

<bundles_post_ra>
// kernel: tpu_custom_call.1
= control target key start
LH: loop header
LB: loop body
LE: loop exit
PB: predicated region body
PF: predicated region fallthrough
CT: control target
= control target key end

     0   :  { %7 = vsyncpa [#allocation3], 0  ;;  %s1527_s0 = inlined_call_operand.hbm [shape: f32[32,64], index: 0, kind: input, shape index: {}]   ;;  %s1528_s1 = inlined_call_operand.hbm [shape: f32[64,256], index: 1, kind: input, shape index: {}]   ;;  %s1529_s2 = inlined_call_operand.hbm [shape: f32[32,256], index: 2, kind: output, shape index: {}]  }
   0x1   :  { %9 = vsyncpa [#allocation3 + $0x1], 0 }
   0x2   :  { %10 = vsyncpa [#allocation6], 0 }
   0x3   :  { %11 = vsyncpa [#allocation4], 0 }
   0x4   :  { %13 = vsyncpa [#allocation4 + $0x1], 0  ;;  %s1085_s9 = smov 0   ;;  %s1087_s10 = smov 0  }
   0x5   :  { %s1089_s11 = smov 0   ;;  %s1091_s12 = smov 0  }
   0x6 LB: > { %s1106_s13 = sadd.s32 4294967295, %s1061_s12   ;;  %s848_s14 = sadd.s32 4294967294, %s1061_s12   ;;  %s1061_s12 = sphi %s1091_s12, %s1539_s12   ;;  %s1057_s11 = sphi %s1089_s11, %s1538_s11   ;;  %s1053_s10 = sphi %s1087_s10, %s1537_s10   ;;  %s1049_s9 = sphi %s1085_s9, %s1536_s9  }
   0x7   : > { %p39_p0 = scmp.ne.s32.totalorder %s1053_s10, %s1049_s9  ;;  %p40_p1 = scmp.eq.s32.totalorder %s1106_s13, 0 }
   0x8   : > { %p84_p2 = scmp.eq.s32.totalorder %s1106_s13, 1  ;;  %p90_p3 = scmp.eq.s32.totalorder %s848_s14, 1 }
   0x9   : > { %p1115_p4 = por %p40_p1, %p39_p0  ;;  %p849_p5 = scmp.ge.s32.totalorder %s1061_s12, 1 }
   0xa   : > { %p1120_p6 = por %p90_p3, %p39_p0  ;;  %p97_p7 = scmp.lt.s32.totalorder %s1061_s12, 3 }
   0xb   : > { %s108_s19 = sshll.u32 %s1528_s1, 4  ;;  %s1063_s21 = smov [#allocation5]   ;;  %s109_s19 = int_to_ptr.hbm [resolvable:$true] %s108_s19 }
   0xc   : > { %p1128_p8 = pnand %p849_p5, %p97_p7  ;;  %s110_s22 = sshll.u32 %s1063_s21, 4  ;;  %s111_s22 = int_to_ptr.vmem [resolvable:$true] %s110_s22 }
   0xd   : > { %s1138_s23 = sadd.s32 1, %s1061_s12   ;;  %s1064_s24 = smov 256  }
   0xe   : > { %p876_p9 = pneg %p1128_p8  ;;  %s1065_s25 = smov 16  }
   0xf   : > { %s23_s26 = ssub.s32 %s1061_s12, %s1138_s23  ;;  %s26_s27 = sadd.s32 1, %s1057_s11 }
  0x10   : > { %p877_p10 = pnand %p876_p9, %p40_p1  ;;  %p24_p12 = scmp.eq.s32.totalorder %s23_s26, 0 }
  0x11   : > { %p33_p13 = scmp.ne.s32.totalorder %s1057_s11, %s1053_s10  ;;  %p34_p0 = scmp.eq.s32.totalorder %s1061_s12, 0 }
  0x12   : > { %879 = dma.hbm_to_vmem [thread:$0]  (!%p877_p10), %s109_s19, 2048, %s111_s22, [#allocation6], %s1064_s24, %s1064_s24, %s1065_s25  }
  0x13   : > { %p889_p3 = scmp.lt.s32.totalorder %s1061_s12, 2  ;;  %p35_p5 = por %p34_p0, %p33_p13 }
  0x14   : > { %s1148_s28 = scalar_select %p24_p12, %s1057_s11, %s26_s27  }
  0x15   : > { %p1152_p7 = por %p84_p2, %p33_p13  ;;  %s124_s30 = sand.u32 1, %s1057_s11  }
  0x16   : > { %s865_s3 = sshll.u32 %s1061_s12, 4  ;;  %s852_s4 = sshll.u32 %s124_s30, 4 }
  0x17   : > { %s133_s7 = scalar_lea.hbm %s1527_s0, %s865_s3  ;;  %s128_s14 = scalar_lea.vmem [#allocation2], %s852_s4 }
  0x18   : > { %s134_s8 = sshll.u32 %s133_s7, 4  ;;  %s136_s17 = sshll.u32 %s128_s14, 4  ;;  %s135_s8 = int_to_ptr.hbm [resolvable:$true] %s134_s8  ;;  %s137_s17 = int_to_ptr.vmem [resolvable:$true] %s136_s17 }
  0x19   : > { %p1163_p9 = pnand %p889_p3, %p35_p5  ;;  %s125_s19 = scalar_lea.sflag [#allocation3], %s124_s30 }
  0x1a   : > { %s961_s21 = sshra.s32 %s135_s8, 4  ;;  %s968_s26 = scalar_lea.hbm %s1527_s0, 32  ;;  %s962_s21 = int_to_ptr.hbm [resolvable:$true] %s961_s21 }
  0x1b   : > { %s963_s22 = scalar_lea.hbm %s962_s21, 16  ;;  %p965_p10 = pneg %p1163_p9 }
  0x1c   : > { %p964_p2 = scmp.ne.s32.totalorder %s962_s21, %s963_s22  ;;  %p969_p0 = scmp.lt.s32.totalorder %s962_s21, %s1527_s0 }
  0x1d   : > { %p970_p3 = scmp.lt.s32.totalorder %s968_s26, %s963_s22 }
  0x1e   : > { %p966_p12 = pnand %p965_p10, %p964_p2 }
  0x1f   : > { %p971_p5 = por %p970_p3, %p969_p0 }
  0x20   : > { %p967_p13 = pneg %p966_p12 }
  0x22   : > { %p972_p11 = pnand %p971_p5, %p967_p13 }
  0x24   : > { %975 = shalt.err (!%p972_p11)
}
  0x25   : > { %s1066_s30 = smov 128   ;;  %s1067_s4 = smov 8  }
  0x26   : > { %883 = dma.hbm_to_vmem [thread:$0]  (!%p1163_p9), %s135_s8, 256, %s137_s17, %s125_s19, %s1066_s30, %s1066_s30, %s1067_s4  }
  0x27   : > { %148 = sbr.rel (%p1128_p8) target bundleno = 256 (0x100), region = 28  ;;  %s1180_s5 = sand.u32 (!%p1128_p8), 1, %s1053_s10  }
  0x28   : > { %s856_s6 = sshll.u32 (!%p1128_p8), %s1180_s5, 4  ;;  %s151_s7 = scalar_lea.sflag (!%p1128_p8), [#allocation3], %s1180_s5 }
  0x29   : > { %s1184_s14 = scalar_lea.vmem (!%p1128_p8), [#allocation2], %s856_s6 }
  0x2c   : > { %1036 = dma.done.wait (%p1115_p4), %s151_s7, 256  }
  0x2d   : > { %1038 = vsyncadd (%p1115_p4), %s151_s7, 4294967040 }
  0x2e   : > { %1040 = dma.done.wait (%p40_p1), [#allocation6], 2048  }
  0x2f   : > { %1042 = vsyncadd (%p40_p1), [#allocation6], 4294965248  ;;  %v199_v0 = vld [vmem:[#allocation5 + $0x70] sm:$0xff]  ;;  %v197_v1 = vld [vmem:[#allocation5 + $0x60] sm:$0xff]  ;;  %vm201_vm0 = vcmask 523264   ;;  %s858_s15 = sshll.u32 %s1180_s5, 5 }
  0x30   : > { %v195_v2 = vld [vmem:[#allocation5 + $0x50] sm:$0xff]  ;;  %v1194_v3 = vand.u32 4294901760, %v199_v0  ;;  %v1196_v4 = vand.u32 4294901760, %v197_v1  ;;  %v193_v6 = vld [vmem:[#allocation5 + $0x40] sm:$0xff]  ;;  %v200_v35 = vld [vmem:[#allocation5 + $0x78] sm:$0xff]  ;;  %s1487_s20 = scalar_lea.vmem [#allocation7], %s858_s15 }
  0x31   : > { %v1198_v5 = vand.u32 4294901760, %v195_v2  ;;  %v191_v7 = vld [vmem:[#allocation5 + $0x30] sm:$0xff]  ;;  %v189_v8 = vld [vmem:[#allocation5 + $0x20] sm:$0xff]  ;;  %v1200_v9 = vand.u32 4294901760, %v193_v6  ;;  %v198_v37 = vld [vmem:[#allocation5 + $0x68] sm:$0xff]  ;;  %v1277_v46 = vand.u32 4294901760, %v200_v35 }
  0x32   : > { %v1202_v10 = vand.u32 4294901760, %v191_v7  ;;  %v1204_v11 = vand.u32 4294901760, %v189_v8  ;;  %v187_v12 = vld [vmem:[#allocation5 + $0x10] sm:$0xff]  ;;  %v185_v13 = vld [vmem:[#allocation5] sm:$0xff]  ;;  %217 = vmatpush.msra.mxu0 %v1194_v3  ;;  %v1209_v15 = vsub.f32 %v199_v0, %v1194_v3  ;;  %366 = vmatpush.msra.mxu3 %v1194_v3  ;;  %v1213_v16 = vsub.f32 %v197_v1, %v1196_v4  ;;  %v184_v42 = vld [vmem:[%s1184_s14 + $0x8] sm:$0xff]  ;;  %s867_s8 = sshll.u32 %s1106_s13, 5 }
  0x33   : > { %v183_v14 = vld [vmem:[%s1184_s14] sm:$0xff]  ;;  %v1216_v17 = vsub.f32 %v195_v2, %v1198_v5  ;;  %v1218_v18 = vand.u32 4294901760, %v187_v12  ;;  %v1221_v19 = vsub.f32 %v193_v6, %v1200_v9  ;;  %v1226_v21 = vand.u32 4294901760, %v185_v13  ;;  %v196_v43 = vld [vmem:[#allocation5 + $0x58] sm:$0xff]  ;;  %v194_v51 = vld [vmem:[#allocation5 + $0x48] sm:$0xff]  ;;  %s761_s19 = scalar_lea.hbm %s1529_s2, %s867_s8  ;;  %s762_s21 = sshll.u32 %s1487_s20, 4  ;;  %s763_s21 = int_to_ptr.vmem [resolvable:$true] %s762_s21 }
  0x34   : > { %v1224_v20 = vsub.f32 %v191_v7, %v1202_v10  ;;  %v1229_v22 = vsub.f32 %v189_v8, %v1204_v11  ;;  %219 = vmatpush.msra.mxu0 %v1196_v4  ;;  %324 = vmatpush.msra.mxu2 %v1209_v15  ;;  %v259_v23 = vand.u32 4294901760, %v1209_v15  ;;  %v265_v24 = vand.u32 4294901760, %v1213_v16  ;;  %v192_v60 = vld [vmem:[#allocation5 + $0x38] sm:$0xff]  ;;  %v190_v1 = vld [vmem:[#allocation5 + $0x28] sm:$0xff]  ;;  %s764_s22 = sshll.u32 %s761_s19, 4  ;;  %s749_s13 = scalar_lea.sflag [#allocation4], %s1180_s5  ;;  %s765_s22 = int_to_ptr.hbm [resolvable:$true] %s764_s22 }
  0x35   : > { %v271_v25 = vand.u32 4294901760, %v1216_v17  ;;  %v203_v26 = vsel %vm201_vm0, %v183_v14, 0  ;;  %368 = vmatpush.msra.mxu3 %v1196_v4  ;;  %v277_v27 = vand.u32 4294901760, %v1221_v19  ;;  %v1243_v30 = vsub.f32 %v187_v12, %v1218_v18  ;;  %s1005_s24 = sshra.s32 %s765_s22, 4  ;;  %s1011_s3 = scalar_lea.hbm %s1529_s2, 64  ;;  %s1006_s24 = int_to_ptr.hbm [resolvable:$true] %s1005_s24 }
  0x36   : > { %v1239_v28 = vand.u32 4294901760, %v203_v26  ;;  %v283_v29 = vand.u32 4294901760, %v1224_v20  ;;  %221 = vmatpush.msra.mxu0 %v1198_v5  ;;  %327 = vmatpush.msra.mxu2 %v1213_v16  ;;  %v260_v31 = vsub.f32 %v1209_v15, %v259_v23  ;;  %v266_v32 = vsub.f32 %v1213_v16, %v265_v24  ;;  %s1007_s25 = scalar_lea.hbm %s1006_s24, 32  ;;  %p1012_p11 = scmp.lt.s32.totalorder %s1006_s24, %s1529_s2 }
  0x37   : > { %v272_v33 = vsub.f32 %v1216_v17, %v271_v25  ;;  %v289_v34 = vand.u32 4294901760, %v1229_v22  ;;  %370 = vmatpush.msra.mxu3 %v1198_v5  ;;  %v278_v40 = vsub.f32 %v1221_v19, %v277_v27  ;;  %v1267_v41 = vsub.f32 %v185_v13, %v1226_v21  ;;  %p1008_p1 = scmp.ne.s32.totalorder %s1006_s24, %s1007_s25  ;;  %p1013_p9 = scmp.lt.s32.totalorder %s1011_s3, %s1007_s25 }
  0x38   : > { %v1259_v36 = vsub.f32 %v203_v26, %v1239_v28  ;;  %223 = vmatpush.msra.mxu0 %v1200_v9  ;;  %v261_v38 = vand.u32 4294901760, %v260_v31  ;;  %330 = vmatpush.msra.mxu2 %v1216_v17  ;;  %v267_v39 = vand.u32 4294901760, %v266_v32  ;;  %v284_v45 = vsub.f32 %v1224_v20, %v283_v29  ;;  %v188_v31 = vld [vmem:[#allocation5 + $0x18] sm:$0xff] }
  0x39   : > { %372 = vmatpush.msra.mxu3 %v1200_v9  ;;  %v273_v47 = vand.u32 4294901760, %v272_v33  ;;  %v290_v48 = vsub.f32 %v1229_v22, %v289_v34  ;;  %v295_v49 = vand.u32 4294901760, %v1243_v30  ;;  %v1284_v50 = vand.u32 4294901760, %v198_v37  ;;  %p1009_p4 = pnand %p1008_p1, %p1152_p7  ;;  %p1014_p2 = por %p1013_p9, %p1012_p11 }
  0x3a   : > { %v1272_v44 = vand.u32 4294901760, %v1259_v36  ;;  %225 = vmatpush.msra.mxu0 %v1202_v10  ;;  %262 = vmatpush.msra.mxu1 %v261_v38  ;;  %v1291_v53 = vsub.f32 %v200_v35, %v1277_v46  ;;  %v206_v54 = vsel %vm201_vm0, %v184_v42, 0  ;;  %v1294_v55 = vand.u32 4294901760, %v196_v43 }
  0x3b   : > { %333 = vmatpush.msra.mxu2 %v1221_v19  ;;  %374 = vmatpush.msra.mxu3 %v1202_v10  ;;  %v279_v56 = vand.u32 4294901760, %v278_v40  ;;  %v301_v57 = vand.u32 4294901760, %v1267_v41  ;;  %v1299_v58 = vsub.f32 %v198_v37, %v1284_v50  ;;  %v1301_v59 = vand.u32 4294901760, %v206_v54  ;;  %v186_v40 = vld [vmem:[#allocation5 + $0x8] sm:$0xff]  ;;  %p1010_p8 = pneg %p1009_p4 }
  0x3c   : > { %v235_v52 = vsub.f32 %v1259_v36, %v1272_v44  ;;  %227 = vmatpush.msra.mxu0 %v1204_v11  ;;  %268 = vmatpush.msra.mxu1 %v267_v39  ;;  %v527_v62 = vand.u32 4294901760, %v1291_v53  ;;  %v1309_v63 = vsub.f32 %v196_v43, %v1294_v55  ;;  %v1311_v0 = vand.u32 4294901760, %v194_v51 }
  0x3d   : > { %336 = vmatpush.msra.mxu2 %v1224_v20  ;;  %376 = vmatpush.msra.mxu3 %v1204_v11  ;;  %v285_v2 = vand.u32 4294901760, %v284_v45  ;;  %v296_v6 = vsub.f32 %v1243_v30, %v295_v49  ;;  %v533_v7 = vand.u32 4294901760, %v1299_v58  ;;  %v1319_v8 = vsub.f32 %v206_v54, %v1301_v59  ;;  %p1015_p10 = pnand %p1014_p2, %p1010_p8 }
  0x3e   : > { %v1305_v61 = vand.u32 4294901760, %v235_v52  ;;  %229 = vmatpush.msra.mxu0 %v1218_v18  ;;  %274 = vmatpush.msra.mxu1 %v273_v47  ;;  %v291_v12 = vand.u32 4294901760, %v290_v48  ;;  %v528_v13 = vsub.f32 %v1291_v53, %v527_v62  ;;  %v1327_v14 = vsub.f32 %v194_v51, %v1311_v0 }
  0x3f   : > { %339 = vmatpush.msra.mxu2 %v1229_v22  ;;  %378 = vmatpush.msra.mxu3 %v1218_v18  ;;  %v1329_v26 = vand.u32 4294901760, %v192_v60  ;;  %v302_v32 = vsub.f32 %v1267_v41, %v301_v57  ;;  %v1336_v33 = vand.u32 4294901760, %v1319_v8  ;;  %v539_v35 = vand.u32 4294901760, %v1309_v63 }
  0x40   : > { %231 = vmatpush.msra.mxu0 %v1226_v21  ;;  %280 = vmatpush.msra.mxu1 %v279_v56  ;;  %v1339_v37 = vand.u32 4294901760, %v190_v1  ;;  %v534_v38 = vsub.f32 %v1299_v58, %v533_v7  ;;  %v297_v42 = vand.u32 4294901760, %v296_v6  ;;  %v545_v45 = vand.u32 4294901760, %v1327_v14 }
  0x41   : > { %237 = vmatmul.f32.vlgmr.msra.gmra.mxu0 %v1305_v61  ;;  %342 = vmatpush.msra.mxu2 %v1243_v30  ;;  %v1347_v39 = vsub.f32 %v192_v60, %v1329_v26  ;;  %v243_v43 = vsub.f32 %v1319_v8, %v1336_v33  ;;  %v1354_v47 = vand.u32 4294901760, %v188_v31  ;;  %v529_v48 = vand.u32 4294901760, %v528_v13 }
  0x42   : > { %286 = vmatpush.msra.mxu1 %v285_v2  ;;  %405 = vmatpush.msrb.mxu0 %v259_v23  ;;  %v1359_v51 = vsub.f32 %v190_v1, %v1339_v37  ;;  %v303_v15 = vand.u32 4294901760, %v302_v32  ;;  %v540_v23 = vsub.f32 %v1309_v63, %v539_v35  ;;  %v1366_v52 = vand.u32 4294901760, %v186_v40 }
  0x43   : > { %345 = vmatpush.msra.mxu2 %v1267_v41  ;;  %380 = vmatpush.msra.mxu3 %v1226_v21  ;;  %v535_v54 = vand.u32 4294901760, %v534_v38  ;;  %v551_v56 = vand.u32 4294901760, %v1347_v39  ;;  %v1372_v60 = vand.u32 4294901760, %v243_v43  ;;  %v546_v16 = vsub.f32 %v1327_v14, %v545_v45 }
  0x44   : > { %292 = vmatpush.msra.mxu1 %v291_v12  ;;  %409 = vmatpush.msrb.mxu0 %v265_v24  ;;  %v1378_v24 = vsub.f32 %v188_v31, %v1354_v47  ;;  %v557_v1 = vand.u32 4294901760, %v1359_v51  ;;  %v541_v2 = vand.u32 4294901760, %v540_v23  ;;  %v1385_v6 = vsub.f32 %v186_v40, %v1366_v52 }
  0x45   : > { %348 = vmatmul.f32.vlgmr.msra.gmra.mxu2 %v1259_v36  ;;  %384 = vmatmul.f32.vlgmr.msra.gmra.mxu3 %v1272_v44  ;;  %v552_v12 = vsub.f32 %v1347_v39, %v551_v56  ;;  %v547_v17 = vand.u32 4294901760, %v546_v16 }
  0x46   : > { %485 = vmatpush.msrb.mxu2 %v1277_v46  ;;  %298 = vmatpush.msra.mxu1 %v297_v42  ;;  %v558_v19 = vsub.f32 %v1359_v51, %v557_v1 }
  0x47   : > { %413 = vmatpush.msrb.mxu0 %v271_v25  ;;  %530 = vmatpush.msrb.mxu3 %v529_v48  ;;  %v563_v25 = vand.u32 4294901760, %v1378_v24  ;;  %v553_v13 = vand.u32 4294901760, %v552_v12 }
  0x48   : > { %487 = vmatpush.msrb.mxu2 %v1284_v50  ;;  %304 = vmatpush.msra.mxu1 %v303_v15  ;;  %v559_v20 = vand.u32 4294901760, %v558_v19 }
  0x49   : > { %417 = vmatpush.msrb.mxu0 %v277_v27  ;;  %536 = vmatpush.msrb.mxu3 %v535_v54  ;;  %v569_v27 = vand.u32 4294901760, %v1385_v6 }
  0x4a   : > { %245 = vmatmul.f32.gmra.mxu0 %v1372_v60  ;;  %306 = vmatmul.f32.vlgmr.msra.gmra.mxu1 %v1239_v28 }
  0x4b   : > { %452 = vmatpush.msrb.mxu1 %v1194_v3  ;;  %489 = vmatpush.msrb.mxu2 %v1294_v55  ;;  %v564_v3 = vsub.f32 %v1378_v24, %v563_v25 }
  0x4c   : > { %421 = vmatpush.msrb.mxu0 %v283_v29  ;;  %542 = vmatpush.msrb.mxu3 %v541_v2 }
  0x4d   : > { %454 = vmatpush.msrb.mxu1 %v1196_v4  ;;  %491 = vmatpush.msrb.mxu2 %v1311_v0  ;;  %v570_v4 = vsub.f32 %v1385_v6, %v569_v27  ;;  %v565_v22 = vand.u32 4294901760, %v564_v3 }
  0x4e   : > { %425 = vmatpush.msrb.mxu0 %v289_v34  ;;  %548 = vmatpush.msrb.mxu3 %v547_v17 }
  0x4f   : > { %353 = vmatmul.f32.gmra.mxu2 %v1319_v8  ;;  %390 = vmatmul.f32.gmra.mxu3 %v1336_v33 }
  0x50   : > { %456 = vmatpush.msrb.mxu1 %v1198_v5  ;;  %493 = vmatpush.msrb.mxu2 %v1329_v26  ;;  %v571_v5 = vand.u32 4294901760, %v570_v4 }
  0x51   : > { %429 = vmatpush.msrb.mxu0 %v295_v49  ;;  %554 = vmatpush.msrb.mxu3 %v553_v13 }
  0x52   : > { %458 = vmatpush.msrb.mxu1 %v1200_v9  ;;  %495 = vmatpush.msrb.mxu2 %v1339_v37 }
  0x53   : > { %433 = vmatpush.msrb.mxu0 %v301_v57  ;;  %560 = vmatpush.msrb.mxu3 %v559_v20 }
  0x54   : > { %310 = vmatmul.f32.gmra.mxu1 %v1301_v59  ;;  %435 = vmatmul.f32.vlgmr.msrb.gmra.mxu0 %v1239_v28 }
  0x55   : > { %460 = vmatpush.msrb.mxu1 %v1202_v10  ;;  %497 = vmatpush.msrb.mxu2 %v1354_v47 }
  0x56   : > { %566 = vmatpush.msrb.mxu3 %v565_v22  ;;  %592 = vmatpush.msra.mxu0 %v1291_v53 }
  0x57   : > { %462 = vmatpush.msrb.mxu1 %v1204_v11  ;;  %499 = vmatpush.msrb.mxu2 %v1366_v52 }
  0x58   : > { %572 = vmatpush.msrb.mxu3 %v571_v5  ;;  %595 = vmatpush.msra.mxu0 %v1299_v58 }
  0x59   : > { %464 = vmatpush.msrb.mxu1 %v1218_v18  ;;  %505 = vmatmul.f32.vlgmr.msrb.gmra.mxu2 %v1305_v61 }
  0x5a   : > { %574 = vmatmul.f32.vlgmr.msrb.gmra.mxu3 %v1239_v28  ;;  %673 = vmatpush.msra.mxu2 %v527_v62 }
  0x5b   : > { %598 = vmatpush.msra.mxu0 %v1309_v63  ;;  %466 = vmatpush.msrb.mxu1 %v1226_v21 }
  0x5c   : > { %677 = vmatpush.msra.mxu2 %v533_v7  ;;  %720 = vmatpush.msra.mxu3 %v1277_v46 }
  0x5d   : > { %601 = vmatpush.msra.mxu0 %v1327_v14  ;;  %468 = vmatmul.f32.vlgmr.msrb.gmra.mxu1 %v1239_v28 }
  0x5e   : > { %439 = vmatmul.f32.gmra.mxu0 %v1301_v59  ;;  %634 = vmatpush.msra.mxu1 %v1277_v46 }
  0x5f   : > { %681 = vmatpush.msra.mxu2 %v539_v35  ;;  %722 = vmatpush.msra.mxu3 %v1284_v50 }
  0x60   : > { %604 = vmatpush.msra.mxu0 %v1347_v39  ;;  %636 = vmatpush.msra.mxu1 %v1284_v50 }
  0x61   : > { %685 = vmatpush.msra.mxu2 %v545_v45  ;;  %724 = vmatpush.msra.mxu3 %v1294_v55 }
  0x62   : > { %607 = vmatpush.msra.mxu0 %v1359_v51  ;;  %513 = vmatmul.f32.gmra.mxu2 %v1372_v60 }
  0x63   : > { %578 = vmatmul.f32.gmra.mxu3 %v1301_v59  ;;  %638 = vmatpush.msra.mxu1 %v1294_v55 }
  0x64   : > { %689 = vmatpush.msra.mxu2 %v551_v56  ;;  %726 = vmatpush.msra.mxu3 %v1311_v0 }
  0x65   : > { %610 = vmatpush.msra.mxu0 %v1378_v24  ;;  %640 = vmatpush.msra.mxu1 %v1311_v0 }
  0x66   : > { %693 = vmatpush.msra.mxu2 %v557_v1  ;;  %728 = vmatpush.msra.mxu3 %v1329_v26 }
  0x67   : > { %613 = vmatpush.msra.mxu0 %v1385_v6  ;;  %472 = vmatmul.f32.gmra.mxu1 %v1301_v59 }
  0x68   : > { %616 = vmatmul.f32.vlgmr.msra.gmra.mxu0 %v1259_v36  ;;  %642 = vmatpush.msra.mxu1 %v1329_v26 }
  0x69   : > { %697 = vmatpush.msra.mxu2 %v563_v25  ;;  %730 = vmatpush.msra.mxu3 %v1339_v37 }
  0x6a   : > { %644 = vmatpush.msra.mxu1 %v1339_v37 }
  0x6b   : > { %701 = vmatpush.msra.mxu2 %v569_v27  ;;  %732 = vmatpush.msra.mxu3 %v1354_v47 }
  0x6c   : > { %646 = vmatpush.msra.mxu1 %v1354_v47  ;;  %703 = vmatmul.f32.vlgmr.msra.gmra.mxu2 %v1239_v28 }
  0x6d   : > { %734 = vmatpush.msra.mxu3 %v1366_v52 }
  0x6e   : > { %648 = vmatpush.msra.mxu1 %v1366_v52  ;;  %736 = vmatmul.f32.vlgmr.msra.gmra.mxu3 %v1239_v28 }
  0x6f   : > { %652 = vmatmul.f32.vlgmr.msra.gmra.mxu1 %v1272_v44 }
  0x70   : > { %621 = vmatmul.f32.gmra.mxu0 %v1319_v8 }
  0x74   : > { %707 = vmatmul.f32.gmra.mxu2 %v1301_v59 }
  0x76   : > { %740 = vmatmul.f32.gmra.mxu3 %v1301_v59 }
  0x77   : > { %658 = vmatmul.f32.gmra.mxu1 %v1336_v33 }
  0xbe   : > { %v238_v9 = vpop.f32.mrf.mxu0 }
  0xc7   : > { %v307_v10 = vpop.f32.mrf.mxu1  ;;  %v246_v11 = vpop.f32.mrf.mxu0 }
  0xc8   : > { %v349_v18 = vpop.f32.mrf.mxu2  ;;  %v385_v21 = vpop.f32.mrf.mxu3  ;;  %v308_v29 = vadd.f32 %v307_v10, %v238_v9 }
  0xca   : > { %v350_v36 = vadd.f32 %v349_v18, %v308_v29 }
  0xcc   : > { %v386_v44 = vadd.f32 %v385_v21, %v350_v36 }
  0xd1   : > { %v311_v30 = vpop.f32.mrf.mxu1  ;;  %v436_v34 = vpop.f32.mrf.mxu0 }
  0xd2   : > { %v354_v28 = vpop.f32.mrf.mxu2  ;;  %v391_v41 = vpop.f32.mrf.mxu3  ;;  %v312_v46 = vadd.f32 %v311_v30, %v246_v11  ;;  %v437_v49 = vadd.f32 %v436_v34, %v386_v44 }
  0xd4   : > { %v355_v58 = vadd.f32 %v354_v28, %v312_v46 }
  0xd6   : > { %v392_v61 = vadd.f32 %v391_v41, %v355_v58 }
  0xda   : > { %v469_v50 = vpop.f32.mrf.mxu1 }
  0xdb   : > { %v470_v53 = vadd.f32 %v469_v50, %v437_v49  ;;  %v440_v55 = vpop.f32.mrf.mxu0 }
  0xdc   : > { %v506_v57 = vpop.f32.mrf.mxu2  ;;  %v441_v62 = vadd.f32 %v440_v55, %v392_v61 }
  0xdd   : > { %744 = vst [vmem:[%s1487_s20] sm:$0xff] %v470_v53  ;;  %v575_v59 = vpop.f32.mrf.mxu3 }
  0xde   : > { %v576_v14 = vadd.f32 %v575_v59, %v506_v57 }
  0xe4   : > { %v473_v63 = vpop.f32.mrf.mxu1 }
  0xe5   : > { %v474_v0 = vadd.f32 %v473_v63, %v441_v62  ;;  %v514_v7 = vpop.f32.mrf.mxu2  ;;  %v617_v8 = vpop.f32.mrf.mxu0 }
  0xe6   : > { %v579_v26 = vpop.f32.mrf.mxu3  ;;  %v618_v31 = vadd.f32 %v617_v8, %v576_v14 }
  0xe7   : > { %746 = vst [vmem:[%s1487_s20 + $0x10] sm:$0xff] %v474_v0  ;;  %v580_v39 = vadd.f32 %v579_v26, %v514_v7 }
  0xec   : > { %v653_v32 = vpop.f32.mrf.mxu1 }
  0xed   : > { %v654_v33 = vadd.f32 %v653_v32, %v618_v31  ;;  %v622_v37 = vpop.f32.mrf.mxu0 }
  0xee   : > { %v623_v43 = vadd.f32 %v622_v37, %v580_v39 }
  0xef   : > { %v704_v35 = vpop.f32.mrf.mxu2 }
  0xf0   : > { %v705_v38 = vadd.f32 %v704_v35, %v654_v33 }
  0xf1   : > { %v737_v40 = vpop.f32.mrf.mxu3 }
  0xf2   : > { %v738_v42 = vadd.f32 %v737_v40, %v705_v38 }
  0xf4   : > { %745 = vst [vmem:[%s1487_s20 + $0x8] sm:$0xff] %v738_v42  ;;  %v659_v45 = vpop.f32.mrf.mxu1 }
  0xf5   : > { %v660_v47 = vadd.f32 %v659_v45, %v623_v43 }
  0xf7   : > { %v708_v48 = vpop.f32.mrf.mxu2 }
  0xf8   : > { %v709_v51 = vadd.f32 %v708_v48, %v660_v47 }
  0xf9   : > { %v741_v15 = vpop.f32.mrf.mxu3 }
  0xfa   : > { %v742_v23 = vadd.f32 %v741_v15, %v709_v51 }
  0xfc   : > { %747 = vst [vmem:[%s1487_s20 + $0x18] sm:$0xff] %v742_v23 }
  0xfd   : > { %1018 = shalt.err (!%p1015_p10)
}
  0xfe   : > { %s1068_s5 = smov 256   ;;  %s1069_s6 = smov 16  }
  0xff   : > { %874 = dma.vmem_to_hbm [thread:$0]  (%p1152_p7), %s763_s21, 512, %s765_s22, %s749_s13, %s1068_s5, %s1068_s5, %s1069_s6  }
 0x100 PF: > { %s779_s7 = sand.u32 1, %s1049_s9   ;;  %p1535_p12 = scmp.ge.s32.totalorder %s1061_s12, 2 }
 0x101   : > { %s780_s14 = scalar_lea.sflag [#allocation4], %s779_s7 }
 0x102   : > { %p885_p13 = pnand %p1535_p12, %p1120_p6 }
 0x104   : > { %p886_p0 = pneg %p885_p13 }
 0x106   : > { %1044 = dma.done.wait (%p886_p0), %s780_s14, 512  }
 0x107   : > { %1046 = vsyncadd (%p886_p0), %s780_s14, 4294966784  ;;  %p16_p3 = scmp.ge.s32.totalorder %s1138_s23, 4   ;;  %s1536_s9 = smov %s1053_s10 }
 0x108   : > { %s1537_s10 = smov %s1057_s11  ;;  %s1538_s11 = smov %s1148_s28 }
 0x109   : > { %s1539_s12 = smov %s1138_s23  ;;  %18 = sbr.rel (!%p16_p3) target bundleno = 6 (0x6), region = 77 }
 0x10e   :  { %786 = vsyncpa [#allocation3], 1 }
 0x10f   :  { %788 = vsyncpa [#allocation3 + $0x1], 1 }
 0x110   :  { %789 = vsyncpa [#allocation6], 1 }
 0x111   :  { %790 = vsyncpa [#allocation4], 1 }
 0x112   :  { %792 = vsyncpa [#allocation4 + $0x1], 1 }

</bundles_post_ra>
